<compile_context>
chip_gen: v7x
topology: tpu7x:2x2x1
jax: 0.10.0
libtpu: 0.0.40
codegen_flags: <defaults>
</compile_context>

<pallas_src>
import jax
import jax.numpy as jnp
from jax.experimental import pallas as pl
from jax.experimental.pallas import tpu as pltpu

ACTION_SIZE = 7
FEATURE_SIZE = 512
HIDDEN = 64
NEG_SLOPE = 0.01  # torch.nn.functional.leaky_relu default
MAX_BATCH_TILE = 256  # rows per grid step for large batches (multiple of 8)


def _leaky_relu(x):
    return jnp.where(x > 0, x, NEG_SLOPE * x)


def policy_mlp_kernel(x_ref, w1_ref, w23_ref, bias_ref, o_ref):
    out_dim = o_ref.shape[1]

    # Static slices of the packed parameter arrays (all tiny, already in VMEM).
    b1 = bias_ref[:, 0:HIDDEN]                          # (1, 64)  f32
    b2 = bias_ref[:, HIDDEN:2 * HIDDEN]                 # (1, 64)  f32
    b3 = bias_ref[:, 2 * HIDDEN:2 * HIDDEN + out_dim]   # (1, 7)   f32
    w2 = w23_ref[:, 0:HIDDEN]                           # (64, 64) bf16
    w3 = w23_ref[:, HIDDEN:HIDDEN + out_dim]            # (64, 7)  bf16

    # fc1: bf16 MXU matmul, f32 accumulation.
    x_bf = x_ref[...].astype(jnp.bfloat16)              # (tb, in_dim)
    h1 = jnp.dot(x_bf, w1_ref[...], preferred_element_type=jnp.float32)
    h1 = _leaky_relu(h1 + b1)

    # fc2
    h2 = jnp.dot(h1.astype(jnp.bfloat16), w2, preferred_element_type=jnp.float32)
    h2 = _leaky_relu(h2 + b2)

    # fc3 (no activation)
    out = jnp.dot(h2.astype(jnp.bfloat16), w3, preferred_element_type=jnp.float32)
    o_ref[...] = (out + b3).astype(o_ref.dtype)


def policy_network_forward(x, params):
    """x: (B, in_dim) f32.
    params: {"w1": bf16 (in,64), "w23": bf16 (64, 64+out), "bias": f32 (1, 128+out)}.
    """
    w1, w23, bias = params["w1"], params["w23"], params["bias"]
    B, in_dim = x.shape
    hidden = w1.shape[1]
    out_dim = w23.shape[1] - hidden
    bias_cols = bias.shape[1]

    # Batch tile: whole batch if small (block == full dim is always legal),
    # otherwise 256-row tiles (multiple of 8 sublanes).
    tb = B if B <= MAX_BATCH_TILE else MAX_BATCH_TILE
    grid = (pl.cdiv(B, tb),)

    return pl.pallas_call(
        policy_mlp_kernel,
        out_shape=jax.ShapeDtypeStruct((B, out_dim), jnp.float32),
        grid=grid,
        in_specs=[
            pl.BlockSpec((tb, in_dim), lambda i: (i, 0)),          # x: tiled over batch
            pl.BlockSpec((in_dim, hidden), lambda i: (0, 0)),      # w1: pinned
            pl.BlockSpec((hidden, hidden + out_dim), lambda i: (0, 0)),  # w2|w3: pinned
            pl.BlockSpec((1, bias_cols), lambda i: (0, 0)),        # biases: pinned
        ],
        out_specs=pl.BlockSpec((tb, out_dim), lambda i: (i, 0)),
        compiler_params=pltpu.CompilerParams(
            dimension_semantics=("parallel",)),
    )(x, w1, w23, bias)


def init_params(key, in_dim, hidden, out_dim):
    """PyTorch-Linear-style uniform init; weights stored (in, out), then packed."""
    ks = jax.random.split(key, 6)

    def lin(kw, kb, fan_in, fan_out):
        bound = 1.0 / jnp.sqrt(fan_in)
        w = jax.random.uniform(kw, (fan_in, fan_out), jnp.float32, -bound, bound)
        b = jax.random.uniform(kb, (1, fan_out), jnp.float32, -bound, bound)
        return w, b

    w1, b1 = lin(ks[0], ks[1], in_dim, hidden)
    w2, b2 = lin(ks[2], ks[3], hidden, hidden)
    w3, b3 = lin(ks[4], ks[5], hidden, out_dim)

    return dict(
        w1=w1.astype(jnp.bfloat16),                                   # (in, 64)
        w23=jnp.concatenate([w2, w3], axis=1).astype(jnp.bfloat16),   # (64, 64+out)
        bias=jnp.concatenate([b1, b2, b3], axis=1),                   # (1, 128+out) f32
    )


def reference_forward(x, params):
    """Pure-JAX reference mirroring the kernel's bf16-weight / f32-accum math."""
    w1, w23, bias = params["w1"], params["w23"], params["bias"]
    out_dim = w23.shape[1] - HIDDEN
    b1 = bias[:, 0:HIDDEN]
    b2 = bias[:, HIDDEN:2 * HIDDEN]
    b3 = bias[:, 2 * HIDDEN:2 * HIDDEN + out_dim]
    w2 = w23[:, 0:HIDDEN]
    w3 = w23[:, HIDDEN:HIDDEN + out_dim]

    h1 = _leaky_relu(
        jnp.dot(x.astype(jnp.bfloat16), w1, preferred_element_type=jnp.float32) + b1)
    h2 = _leaky_relu(
        jnp.dot(h1.astype(jnp.bfloat16), w2, preferred_element_type=jnp.float32) + b2)
    return jnp.dot(h2.astype(jnp.bfloat16), w3, preferred_element_type=jnp.float32) + b3


if __name__ == "__main__":
    n_obs, n_pred = 1, 1
    in_dim = 4 * n_obs * FEATURE_SIZE          # 2048
    hidden = HIDDEN                            # 64
    out_dim = n_pred * ACTION_SIZE             # 7
    batch = 2

    key = jax.random.PRNGKey(0)
    k_x, k_p = jax.random.split(key)
    x = jax.random.normal(k_x, (batch, in_dim), jnp.float32)
    params = init_params(k_p, in_dim, hidden, out_dim)

    out = policy_network_forward(x, params)
    out = jax.block_until_ready(out)

    ref = reference_forward(x, params)
    assert out.shape == (batch, out_dim)
    # bf16 weights -> slightly looser tolerance than the pure-f32 version.
    assert jnp.allclose(out, ref, atol=1e-2, rtol=1e-2)

    print("KERNEL_OK")
</pallas_src>

<mosaic_0001>
module attributes {stable_mosaic.version = 11 : i64} {
  func.func @policy_mlp_kernel(%arg0: i32, %arg1: memref<2x2048xf32, #tpu.memory_space<vmem>>, %arg2: memref<2048x64xbf16, #tpu.memory_space<vmem>>, %arg3: memref<64x71xbf16, #tpu.memory_space<vmem>>, %arg4: memref<1x135xf32, #tpu.memory_space<vmem>>, %arg5: memref<2x7xf32, #tpu.memory_space<vmem>>) attributes {dimension_semantics = [#tpu.dimension_semantics<parallel>], iteration_bounds = array<i64: 1>, scalar_prefetch = 0 : i64, scratch_operands = 0 : i64, tpu.core_type = #tpu.core_type<tc>, window_params = [{transform_indices = @transform_0, window_bounds = array<i64: 2, 2048>}, {pipeline_mode = #tpu.pipeline_mode<synchronous>, transform_indices = @transform_1, window_bounds = array<i64: 2048, 64>}, {pipeline_mode = #tpu.pipeline_mode<synchronous>, transform_indices = @transform_2, window_bounds = array<i64: 64, 71>}, {pipeline_mode = #tpu.pipeline_mode<synchronous>, transform_indices = @transform_3, window_bounds = array<i64: 1, 135>}, {transform_indices = @transform_4, window_bounds = array<i64: 2, 7>}]} {
    %c0 = arith.constant 0 : index
    %c0_0 = arith.constant 0 : index
    %0 = vector.load %arg4[%c0, %c0_0] : memref<1x135xf32, #tpu.memory_space<vmem>>, vector<1x64xf32>
    %c0_1 = arith.constant 0 : index
    %c64 = arith.constant 64 : index
    %1 = vector.load %arg4[%c0_1, %c64] : memref<1x135xf32, #tpu.memory_space<vmem>>, vector<1x64xf32>
    %c0_2 = arith.constant 0 : index
    %c128 = arith.constant 128 : index
    %2 = vector.load %arg4[%c0_2, %c128] : memref<1x135xf32, #tpu.memory_space<vmem>>, vector<1x7xf32>
    %c0_3 = arith.constant 0 : index
    %c0_4 = arith.constant 0 : index
    %3 = vector.load %arg3[%c0_3, %c0_4] : memref<64x71xbf16, #tpu.memory_space<vmem>>, vector<64x64xbf16>
    %c0_5 = arith.constant 0 : index
    %c64_6 = arith.constant 64 : index
    %4 = vector.load %arg3[%c0_5, %c64_6] : memref<64x71xbf16, #tpu.memory_space<vmem>>, vector<64x7xbf16>
    %c0_7 = arith.constant 0 : index
    %c0_8 = arith.constant 0 : index
    %5 = vector.load %arg1[%c0_7, %c0_8] : memref<2x2048xf32, #tpu.memory_space<vmem>>, vector<2x2048xf32>
    %6 = arith.truncf %5 : vector<2x2048xf32> to vector<2x2048xbf16>
    %c0_9 = arith.constant 0 : index
    %c0_10 = arith.constant 0 : index
    %7 = vector.load %arg2[%c0_9, %c0_10] : memref<2048x64xbf16, #tpu.memory_space<vmem>>, vector<2048x64xbf16>
    %cst = arith.constant dense<0.000000e+00> : vector<2x64xf32>
    %8 = tpu.matmul %6, %7, %cst {dimension_numbers = #tpu.dot_dimension_numbers<[1], [0], [0], [1], [0, 0, 1, 1], [], []>} : vector<2x2048xbf16>, vector<2048x64xbf16>, vector<2x64xf32> -> vector<2x64xf32>
    %9 = vector.broadcast %0 : vector<1x64xf32> to vector<2x64xf32>
    %10 = arith.addf %8, %9 : vector<2x64xf32>
    %cst_11 = arith.constant 0.000000e+00 : f32
    %11 = vector.broadcast %cst_11 : f32 to vector<2x64xf32>
    %12 = arith.cmpf ogt, %10, %11 : vector<2x64xf32>
    %cst_12 = arith.constant 0.00999999977 : f32
    %13 = vector.broadcast %cst_12 : f32 to vector<2x64xf32>
    %14 = arith.mulf %13, %10 : vector<2x64xf32>
    %15 = arith.select %12, %10, %14 : vector<2x64xi1>, vector<2x64xf32>
    %16 = arith.truncf %15 : vector<2x64xf32> to vector<2x64xbf16>
    %cst_13 = arith.constant dense<0.000000e+00> : vector<2x64xf32>
    %17 = tpu.matmul %16, %3, %cst_13 {dimension_numbers = #tpu.dot_dimension_numbers<[1], [0], [0], [1], [0, 0, 1, 1], [], []>} : vector<2x64xbf16>, vector<64x64xbf16>, vector<2x64xf32> -> vector<2x64xf32>
    %18 = vector.broadcast %1 : vector<1x64xf32> to vector<2x64xf32>
    %19 = arith.addf %17, %18 : vector<2x64xf32>
    %cst_14 = arith.constant 0.000000e+00 : f32
    %20 = vector.broadcast %cst_14 : f32 to vector<2x64xf32>
    %21 = arith.cmpf ogt, %19, %20 : vector<2x64xf32>
    %cst_15 = arith.constant 0.00999999977 : f32
    %22 = vector.broadcast %cst_15 : f32 to vector<2x64xf32>
    %23 = arith.mulf %22, %19 : vector<2x64xf32>
    %24 = arith.select %21, %19, %23 : vector<2x64xi1>, vector<2x64xf32>
    %25 = arith.truncf %24 : vector<2x64xf32> to vector<2x64xbf16>
    %cst_16 = arith.constant dense<0.000000e+00> : vector<2x7xf32>
    %26 = tpu.matmul %25, %4, %cst_16 {dimension_numbers = #tpu.dot_dimension_numbers<[1], [0], [0], [1], [0, 0, 1, 1], [], []>} : vector<2x64xbf16>, vector<64x7xbf16>, vector<2x7xf32> -> vector<2x7xf32>
    %27 = vector.broadcast %2 : vector<1x7xf32> to vector<2x7xf32>
    %28 = arith.addf %26, %27 : vector<2x7xf32>
    %c0_17 = arith.constant 0 : index
    %c0_18 = arith.constant 0 : index
    %29 = vector.load %arg5[%c0_17, %c0_18] : memref<2x7xf32, #tpu.memory_space<vmem>>, vector<2x7xf32>
    tpu.vector_store %arg5[%c0_17, %c0_18], %28 {strides = array<i32>} : memref<2x7xf32, #tpu.memory_space<vmem>>, vector<2x7xf32>,
    return
  }
  func.func @transform_0(%arg0: i32) -> (i32, i32) {
    %c0_i32 = arith.constant 0 : i32
    %c0_i32_0 = arith.constant 0 : i32
    return %arg0, %c0_i32 : i32, i32
  }
  func.func @transform_1(%arg0: i32) -> (i32, i32) {
    %c0_i32 = arith.constant 0 : i32
    %c0_i32_0 = arith.constant 0 : i32
    %c0_i32_1 = arith.constant 0 : i32
    return %c0_i32, %c0_i32_0 : i32, i32
  }
  func.func @transform_2(%arg0: i32) -> (i32, i32) {
    %c0_i32 = arith.constant 0 : i32
    %c0_i32_0 = arith.constant 0 : i32
    %c0_i32_1 = arith.constant 0 : i32
    return %c0_i32, %c0_i32_0 : i32, i32
  }
  func.func @transform_3(%arg0: i32) -> (i32, i32) {
    %c0_i32 = arith.constant 0 : i32
    %c0_i32_0 = arith.constant 0 : i32
    %c0_i32_1 = arith.constant 0 : i32
    return %c0_i32, %c0_i32_0 : i32, i32
  }
  func.func @transform_4(%arg0: i32) -> (i32, i32) {
    %c0_i32 = arith.constant 0 : i32
    %c0_i32_0 = arith.constant 0 : i32
    return %arg0, %c0_i32 : i32, i32
  }
}

</mosaic_0001>

<bundles_post_ra>
// kernel: tpu_custom_call.1
= control target key start
LH: loop header
LB: loop body
LE: loop exit
PB: predicated region body
PF: predicated region fallthrough
CT: control target
= control target key end

     0   :  { %v41_v28 = vlaneseq  ;;  %v2154_v36 = vmov 1983009808   ;;  %s2632_s0 = inlined_call_operand.vmem [shape: f32[2,2048], index: 0, kind: input, shape index: {}]   ;;  %s2633_s1 = inlined_call_operand.vmem [shape: bf16[2048,64], index: 1, kind: input, shape index: {}]   ;;  %s2634_s2 = inlined_call_operand.vmem [shape: bf16[64,71], index: 2, kind: input, shape index: {}]   ;;  %s2635_s3 = inlined_call_operand.vmem [shape: f32[1,135], index: 3, kind: input, shape index: {}]   ;;  %s2636_s4 = inlined_call_operand.hbm [shape: f32[2,7], index: 4, kind: output, shape index: {}]  }
   0x1   :  { %v1994_v0 = vld [vmem:[%s2633_s1 + $0x40] sm:$0xff]   ;;  %v1998_v4 = vld [vmem:[%s2633_s1 + $0x48] sm:$0xff]   ;;  %v2002_v8 = vld [vmem:[%s2633_s1 + $0x50] sm:$0xff]   ;;  %v39_v37 = vunpack.c.l.s4 %v2154_v36 }
   0x2   :  { %v1995_v1 = vld [vmem:[%s2633_s1 + $0xc0] sm:$0xff]   ;;  %1779 = vmatprep.subr.bf16.mxu0 %v1994_v0  ;;  %v1999_v5 = vld [vmem:[%s2633_s1 + $0xc8] sm:$0xff]   ;;  %v2003_v9 = vld [vmem:[%s2633_s1 + $0xd0] sm:$0xff]   ;;  %v42_v33 = vshrl.u32 %v41_v28, 7 }
   0x3   :  { %v1996_v2 = vld [vmem:[%s2633_s1] sm:$0xff]   ;;  %1801 = vmatprep.subr.bf16.mxu1 %v1995_v1  ;;  %v2000_v6 = vld [vmem:[%s2633_s1 + $0x8] sm:$0xff]   ;;  %v2004_v10 = vld [vmem:[%s2633_s1 + $0x10] sm:$0xff]   ;;  %v40_v39 = vunpack.c.0.s8 %v39_v37 }
   0x4   :  { %v1997_v3 = vld [vmem:[%s2633_s1 + $0x80] sm:$0xff]   ;;  %1780 = vmatpush3.bf16.msra.mxu0 %v1996_v2  ;;  %v2001_v7 = vld [vmem:[%s2633_s1 + $0x88] sm:$0xff]   ;;  %v2005_v11 = vld [vmem:[%s2633_s1 + $0x90] sm:$0xff]  }
   0x5   :  { %1802 = vmatpush3.bf16.msra.mxu1 %v1997_v3  ;;  %1781 = vmatprep.subr.bf16.mxu0 %v1998_v4  ;;  %v2006_v12 = vld [vmem:[%s2633_s1 + $0x58] sm:$0xff]   ;;  %v2010_v16 = vld [vmem:[%s2633_s1 + $0x60] sm:$0xff]   ;;  %v2014_v20 = vld [vmem:[%s2633_s1 + $0x68] sm:$0xff]   ;;  %v2289_v41 = vsub.s32 %v40_v39, %v42_v33 }
   0x6   :  { %1803 = vmatprep.subr.bf16.mxu1 %v1999_v5  ;;  %v2007_v13 = vld [vmem:[%s2633_s1 + $0xd8] sm:$0xff]   ;;  %v2011_v17 = vld [vmem:[%s2633_s1 + $0xe0] sm:$0xff]   ;;  %v2015_v21 = vld [vmem:[%s2633_s1 + $0xe8] sm:$0xff]  }
   0x7   :  { %v2008_v14 = vld [vmem:[%s2633_s1 + $0x18] sm:$0xff]   ;;  %v2012_v18 = vld [vmem:[%s2633_s1 + $0x20] sm:$0xff]   ;;  %v2016_v22 = vld [vmem:[%s2633_s1 + $0x28] sm:$0xff]  }
   0x8   :  { %1782 = vmatpush3.bf16.msra.mxu0 %v2000_v6  ;;  %v2009_v15 = vld [vmem:[%s2633_s1 + $0x98] sm:$0xff]   ;;  %v2013_v19 = vld [vmem:[%s2633_s1 + $0xa0] sm:$0xff]   ;;  %v2017_v23 = vld [vmem:[%s2633_s1 + $0xa8] sm:$0xff]  }
   0x9   :  { %1804 = vmatpush3.bf16.msra.mxu1 %v2001_v7  ;;  %1783 = vmatprep.subr.bf16.mxu0 %v2002_v8  ;;  %v2018_v24 = vld [vmem:[%s2633_s1 + $0x70] sm:$0xff]   ;;  %v2022_v29 = vld [vmem:[%s2633_s1 + $0x78] sm:$0xff]   ;;  %v29_v34 = vld [vmem:[%s2632_s0] sm:$0xff] }
   0xa   :  { %1805 = vmatprep.subr.bf16.mxu1 %v2003_v9  ;;  %v2019_v25 = vld [vmem:[%s2633_s1 + $0xf0] sm:$0xff]   ;;  %v2023_v30 = vld [vmem:[%s2633_s1 + $0xf8] sm:$0xff]   ;;  %v2027_v35 = vld [vmem:[%s2633_s1 + $0x140] sm:$0xff]   ;;  %v37_v40 = vcombine.high %v29_v34, %v29_v34  ;;  %v44_v42 = vrot.slane %v29_v34, %v2289_v41 }
   0xb   :  { %v2020_v26 = vld [vmem:[%s2633_s1 + $0x30] sm:$0xff]   ;;  %v2024_v31 = vld [vmem:[%s2633_s1 + $0x38] sm:$0xff]   ;;  %v2028_v38 = vld [vmem:[%s2633_s1 + $0x1c0] sm:$0xff]  }
   0xc   :  { %1784 = vmatpush3.bf16.msra.mxu0 %v2004_v10  ;;  %v2021_v27 = vld [vmem:[%s2633_s1 + $0xb0] sm:$0xff]   ;;  %v2025_v32 = vld [vmem:[%s2633_s1 + $0xb8] sm:$0xff]   ;;  %v51_v43 = vrot.slane %v37_v40, %v2289_v41  ;;  %v52_v44 = vcombine.high %v44_v42, %v44_v42  ;;  %v2029_v46 = vld [vmem:[%s2633_s1 + $0x100] sm:$0xff]   ;;  %v121_v47 = vpack.c.bf16 %v44_v42, %v44_v42 }
   0xd   :  { %1806 = vmatpush3.bf16.msra.mxu1 %v2005_v11  ;;  %1785 = vmatprep.subr.bf16.mxu0 %v2006_v12  ;;  %v2030_v49 = vld [vmem:[%s2633_s1 + $0x180] sm:$0xff]   ;;  %v2031_v52 = vld [vmem:[%s2633_s1 + $0x148] sm:$0xff]   ;;  %v2035_v56 = vld [vmem:[%s2633_s1 + $0x150] sm:$0xff]  }
   0xe   :  { %1807 = vmatprep.subr.bf16.mxu1 %v2007_v13  ;;  %v53_v45 = vcombine.high %v51_v43, %v51_v43  ;;  %v123_v48 = vpack.c.bf16 %v51_v43, %v51_v43  ;;  %v122_v50 = vpack.c.bf16 %v52_v44, %v52_v44  ;;  %v2032_v53 = vld [vmem:[%s2633_s1 + $0x1c8] sm:$0xff]   ;;  %v2036_v57 = vld [vmem:[%s2633_s1 + $0x1d0] sm:$0xff]   ;;  %v2039_v60 = vld [vmem:[%s2633_s1 + $0x158] sm:$0xff]  }
   0xf   :  { %v2033_v54 = vld [vmem:[%s2633_s1 + $0x108] sm:$0xff]   ;;  %v2037_v58 = vld [vmem:[%s2633_s1 + $0x110] sm:$0xff]   ;;  %v2040_v61 = vld [vmem:[%s2633_s1 + $0x1d8] sm:$0xff]  }
  0x10   :  { %1786 = vmatpush3.bf16.msra.mxu0 %v2008_v14  ;;  %v124_v51 = vpack.c.bf16 %v53_v45, %v53_v45  ;;  %1199 = vmatprep.mubr.bf16.mxu0 %v122_v50  ;;  %v2034_v55 = vld [vmem:[%s2633_s1 + $0x188] sm:$0xff]   ;;  %v2038_v59 = vld [vmem:[%s2633_s1 + $0x190] sm:$0xff]   ;;  %v2041_v62 = vld [vmem:[%s2633_s1 + $0x118] sm:$0xff]  }
  0x11   :  { %1808 = vmatpush3.bf16.msra.mxu1 %v2009_v15  ;;  %1787 = vmatprep.subr.bf16.mxu0 %v2010_v16  ;;  %v2042_v63 = vld [vmem:[%s2633_s1 + $0x198] sm:$0xff]   ;;  %v2043_v0 = vld [vmem:[%s2633_s1 + $0x160] sm:$0xff]   ;;  %v2047_v4 = vld [vmem:[%s2633_s1 + $0x168] sm:$0xff]  }
  0x12   :  { %1809 = vmatprep.subr.bf16.mxu1 %v2011_v17  ;;  %1239 = vmatprep.mubr.bf16.mxu1 %v124_v51  ;;  %v2044_v1 = vld [vmem:[%s2633_s1 + $0x1e0] sm:$0xff]   ;;  %v2048_v5 = vld [vmem:[%s2633_s1 + $0x1e8] sm:$0xff]   ;;  %v2051_v8 = vld [vmem:[%s2633_s1 + $0x170] sm:$0xff]  }
  0x13   :  { %v2045_v2 = vld [vmem:[%s2633_s1 + $0x120] sm:$0xff]   ;;  %v2049_v6 = vld [vmem:[%s2633_s1 + $0x128] sm:$0xff]   ;;  %v2052_v9 = vld [vmem:[%s2633_s1 + $0x1f0] sm:$0xff]  }
  0x14   :  { %1788 = vmatpush3.bf16.msra.mxu0 %v2012_v18  ;;  %v2046_v3 = vld [vmem:[%s2633_s1 + $0x1a0] sm:$0xff]   ;;  %v2050_v7 = vld [vmem:[%s2633_s1 + $0x1a8] sm:$0xff]   ;;  %v2053_v11 = vld [vmem:[%s2633_s1 + $0x130] sm:$0xff]  }
  0x15   :  { %1810 = vmatpush3.bf16.msra.mxu1 %v2013_v19  ;;  %1789 = vmatprep.subr.bf16.mxu0 %v2014_v20  ;;  %v30_v10 = vld [vmem:[%s2632_s0 + $0x8] sm:$0xff]  ;;  %v2054_v14 = vld [vmem:[%s2633_s1 + $0x1b0] sm:$0xff]   ;;  %v2055_v15 = vld [vmem:[%s2633_s1 + $0x178] sm:$0xff]  }
  0x16   :  { %1811 = vmatprep.subr.bf16.mxu1 %v2015_v21  ;;  %v61_v12 = vrot.slane %v30_v10, %v2289_v41  ;;  %v54_v13 = vcombine.high %v30_v10, %v30_v10  ;;  %v2056_v18 = vld [vmem:[%s2633_s1 + $0x1f8] sm:$0xff]   ;;  %v2067_v33 = vld [vmem:[%s2633_s1 + $0x288] sm:$0xff]   ;;  %v2068_v34 = vld [vmem:[%s2633_s1 + $0x250] sm:$0xff]  }
  0x17   :  { %v2057_v19 = vld [vmem:[%s2633_s1 + $0x138] sm:$0xff]   ;;  %v2070_v36 = vld [vmem:[%s2633_s1 + $0x210] sm:$0xff]   ;;  %v2076_v43 = vld [vmem:[%s2633_s1 + $0x260] sm:$0xff]  }
  0x18   :  { %1790 = vmatpush3.bf16.msra.mxu0 %v2016_v22  ;;  %v69_v16 = vcombine.high %v61_v12, %v61_v12  ;;  %v68_v17 = vrot.slane %v54_v13, %v2289_v41  ;;  %v2058_v22 = vld [vmem:[%s2633_s1 + $0x1b8] sm:$0xff]   ;;  %v2071_v37 = vld [vmem:[%s2633_s1 + $0x290] sm:$0xff]   ;;  %v2077_v44 = vld [vmem:[%s2633_s1 + $0x2e0] sm:$0xff]  }
  0x19   :  { %1812 = vmatpush3.bf16.msra.mxu1 %v2017_v23  ;;  %1791 = vmatprep.subr.bf16.mxu0 %v2018_v24  ;;  %v2060_v24 = vld [vmem:[%s2633_s1 + $0x240] sm:$0xff]   ;;  %v2073_v39 = vld [vmem:[%s2633_s1 + $0x2d8] sm:$0xff]   ;;  %v2083_v50 = vld [vmem:[%s2633_s1 + $0x2a8] sm:$0xff]  }
  0x1a   :  { %1813 = vmatprep.subr.bf16.mxu1 %v2019_v25  ;;  %v126_v20 = vpack.c.bf16 %v69_v16, %v69_v16  ;;  %v70_v21 = vcombine.high %v68_v17, %v68_v17  ;;  %v2061_v25 = vld [vmem:[%s2633_s1 + $0x2c0] sm:$0xff]   ;;  %v127_v28 = vpack.c.bf16 %v68_v17, %v68_v17  ;;  %v2074_v40 = vld [vmem:[%s2633_s1 + $0x218] sm:$0xff]   ;;  %v2084_v51 = vld [vmem:[%s2633_s1 + $0x270] sm:$0xff]  }
  0x1b   :  { %v2075_v42 = vld [vmem:[%s2633_s1 + $0x298] sm:$0xff]   ;;  %v2078_v45 = vld [vmem:[%s2633_s1 + $0x220] sm:$0xff]   ;;  %v2098_v10 = vld [vmem:[%s2633_s1 + $0x3c8] sm:$0xff]  }
  0x1c   :  { %1792 = vmatpush3.bf16.msra.mxu0 %v2020_v26  ;;  %v128_v23 = vpack.c.bf16 %v70_v21, %v70_v21  ;;  %v2062_v26 = vld [vmem:[%s2633_s1 + $0x200] sm:$0xff]   ;;  %v2101_v13 = vld [vmem:[%s2633_s1 + $0x350] sm:$0xff]   ;;  %v2105_v17 = vld [vmem:[%s2633_s1 + $0x358] sm:$0xff]  }
  0x1d   :  { %1814 = vmatpush3.bf16.msra.mxu1 %v2021_v27  ;;  %1793 = vmatprep.subr.bf16.mxu0 %v2022_v29  ;;  %v125_v27 = vpack.c.bf16 %v61_v12, %v61_v12  ;;  %v2063_v29 = vld [vmem:[%s2633_s1 + $0x280] sm:$0xff]   ;;  %v2100_v12 = vld [vmem:[%s2633_s1 + $0x388] sm:$0xff]   ;;  %v2104_v16 = vld [vmem:[%s2633_s1 + $0x390] sm:$0xff]  }
  0x1e   :  { %1815 = vmatprep.subr.bf16.mxu1 %v2023_v30  ;;  %v2064_v30 = vld [vmem:[%s2633_s1 + $0x248] sm:$0xff]   ;;  %v2109_v21 = vld [vmem:[%s2633_s1 + $0x360] sm:$0xff]  }
  0x20   :  { %1794 = vmatpush3.bf16.msra.mxu0 %v2024_v31  ;;  %v2065_v31 = vld [vmem:[%s2633_s1 + $0x2c8] sm:$0xff]  }
  0x21   :  { %1816 = vmatpush3.bf16.msra.mxu1 %v2025_v32  ;;  %1823 = vmatprep.subr.bf16.mxu0 %v2027_v35  ;;  %v2066_v32 = vld [vmem:[%s2633_s1 + $0x208] sm:$0xff]   ;;  %v2069_v35 = vld [vmem:[%s2633_s1 + $0x2d0] sm:$0xff]  }
  0x22   :  { %1845 = vmatprep.subr.bf16.mxu1 %v2028_v38  ;;  %v2072_v38 = vld [vmem:[%s2633_s1 + $0x258] sm:$0xff]  }
  0x23   :  { %1200 = vmatmul.mubr.bf16.vlgmr.msra.gmra.mrb[0].mxu0 %v121_v47  ;;  %v2080_v47 = vld [vmem:[%s2633_s1 + $0x268] sm:$0xff]  }
  0x24   :  { %1240 = vmatmul.mubr.bf16.vlgmr.msra.gmra.mrb[0].mxu1 %v123_v48  ;;  %1824 = vmatpush3.bf16.msra.mxu0 %v2029_v46  ;;  %v2079_v46 = vld [vmem:[%s2633_s1 + $0x2a0] sm:$0xff]   ;;  %v2081_v48 = vld [vmem:[%s2633_s1 + $0x2e8] sm:$0xff]  }
  0x25   :  { %1846 = vmatpush3.bf16.msra.mxu1 %v2030_v49  ;;  %1825 = vmatprep.subr.bf16.mxu0 %v2031_v52  ;;  %v2082_v49 = vld [vmem:[%s2633_s1 + $0x228] sm:$0xff]   ;;  %v2085_v52 = vld [vmem:[%s2633_s1 + $0x2f0] sm:$0xff]  }
  0x26   :  { %1847 = vmatprep.subr.bf16.mxu1 %v2032_v53  ;;  %1279 = vmatprep.mubr.bf16.mxu0 %v126_v20  ;;  %v31_v53 = vld [vmem:[%s2632_s0 + $0x10] sm:$0xff]  ;;  %v2108_v20 = vld [vmem:[%s2633_s1 + $0x398] sm:$0xff]  }
  0x27   :  { %1319 = vmatprep.mubr.bf16.mxu1 %v128_v23  ;;  %v2111_v23 = vld [vmem:[%s2633_s1 + $0x320] sm:$0xff]  }
  0x28   :  { %1826 = vmatpush3.bf16.msra.mxu0 %v2033_v54  ;;  %v2086_v54 = vld [vmem:[%s2633_s1 + $0x230] sm:$0xff]  }
  0x29   :  { %1848 = vmatpush3.bf16.msra.mxu1 %v2034_v55  ;;  %1827 = vmatprep.subr.bf16.mxu0 %v2035_v56  ;;  %v78_v55 = vrot.slane %v31_v53, %v2289_v41  ;;  %v71_v56 = vcombine.high %v31_v53, %v31_v53 }
  0x2a   :  { %1849 = vmatprep.subr.bf16.mxu1 %v2036_v57  ;;  %v2087_v57 = vld [vmem:[%s2633_s1 + $0x2b0] sm:$0xff]  }
  0x2c   :  { %1828 = vmatpush3.bf16.msra.mxu0 %v2037_v58  ;;  %v2088_v58 = vld [vmem:[%s2633_s1 + $0x278] sm:$0xff]  }
  0x2d   :  { %1850 = vmatpush3.bf16.msra.mxu1 %v2038_v59  ;;  %1829 = vmatprep.subr.bf16.mxu0 %v2039_v60  ;;  %v86_v59 = vcombine.high %v78_v55, %v78_v55  ;;  %v85_v60 = vrot.slane %v71_v56, %v2289_v41 }
  0x2e   :  { %1851 = vmatprep.subr.bf16.mxu1 %v2040_v61  ;;  %v2089_v61 = vld [vmem:[%s2633_s1 + $0x2f8] sm:$0xff]  }
  0x30   :  { %1830 = vmatpush3.bf16.msra.mxu0 %v2041_v62  ;;  %v2090_v62 = vld [vmem:[%s2633_s1 + $0x238] sm:$0xff]  }
  0x31   :  { %1852 = vmatpush3.bf16.msra.mxu1 %v2042_v63  ;;  %1831 = vmatprep.subr.bf16.mxu0 %v2043_v0  ;;  %v130_v63 = vpack.c.bf16 %v86_v59, %v86_v59  ;;  %v87_v0 = vcombine.high %v85_v60, %v85_v60 }
  0x32   :  { %1853 = vmatprep.subr.bf16.mxu1 %v2044_v1  ;;  %v2091_v1 = vld [vmem:[%s2633_s1 + $0x2b8] sm:$0xff]  }
  0x34   :  { %1832 = vmatpush3.bf16.msra.mxu0 %v2045_v2  ;;  %v132_v2 = vpack.c.bf16 %v87_v0, %v87_v0 }
  0x35   :  { %1854 = vmatpush3.bf16.msra.mxu1 %v2046_v3  ;;  %1833 = vmatprep.subr.bf16.mxu0 %v2047_v4  ;;  %v2093_v3 = vld [vmem:[%s2633_s1 + $0x340] sm:$0xff]  }
  0x36   :  { %1855 = vmatprep.subr.bf16.mxu1 %v2048_v5  ;;  %v2094_v4 = vld [vmem:[%s2633_s1 + $0x3c0] sm:$0xff]  }
  0x37   :  { %v2095_v5 = vld [vmem:[%s2633_s1 + $0x300] sm:$0xff]  }
  0x38   :  { %1834 = vmatpush3.bf16.msra.mxu0 %v2049_v6  ;;  %v129_v6 = vpack.c.bf16 %v78_v55, %v78_v55 }
  0x39   :  { %1856 = vmatpush3.bf16.msra.mxu1 %v2050_v7  ;;  %1835 = vmatprep.subr.bf16.mxu0 %v2051_v8  ;;  %v131_v7 = vpack.c.bf16 %v85_v60, %v85_v60  ;;  %v2096_v8 = vld [vmem:[%s2633_s1 + $0x380] sm:$0xff]  }
  0x3a   :  { %1857 = vmatprep.subr.bf16.mxu1 %v2052_v9  ;;  %v2097_v9 = vld [vmem:[%s2633_s1 + $0x348] sm:$0xff]  }
  0x3c   :  { %1836 = vmatpush3.bf16.msra.mxu0 %v2053_v11  ;;  %v2099_v11 = vld [vmem:[%s2633_s1 + $0x308] sm:$0xff]  }
  0x3d   :  { %1858 = vmatpush3.bf16.msra.mxu1 %v2054_v14  ;;  %1837 = vmatprep.subr.bf16.mxu0 %v2055_v15  ;;  %v2102_v14 = vld [vmem:[%s2633_s1 + $0x3d0] sm:$0xff]  }
  0x3e   :  { %1859 = vmatprep.subr.bf16.mxu1 %v2056_v18  ;;  %v2103_v15 = vld [vmem:[%s2633_s1 + $0x310] sm:$0xff]   ;;  %v2106_v18 = vld [vmem:[%s2633_s1 + $0x3d8] sm:$0xff]  }
  0x40   :  { %1838 = vmatpush3.bf16.msra.mxu0 %v2057_v19  ;;  %v2107_v19 = vld [vmem:[%s2633_s1 + $0x318] sm:$0xff]  }
  0x41   :  { %1860 = vmatpush3.bf16.msra.mxu1 %v2058_v22  ;;  %1867 = vmatprep.subr.bf16.mxu0 %v2060_v24  ;;  %v2110_v22 = vld [vmem:[%s2633_s1 + $0x3e0] sm:$0xff]  }
  0x42   :  { %1889 = vmatprep.subr.bf16.mxu1 %v2061_v25  ;;  %v2112_v24 = vld [vmem:[%s2633_s1 + $0x3a0] sm:$0xff]   ;;  %v2113_v25 = vld [vmem:[%s2633_s1 + $0x368] sm:$0xff]  }
  0x43   :  { %1280 = vmatmul.mubr.bf16.vlgmr.msra.gmra.mrb[4].mxu0 %v125_v27  ;;  %v2115_v27 = vld [vmem:[%s2633_s1 + $0x328] sm:$0xff]  }
  0x44   :  { %1320 = vmatmul.mubr.bf16.vlgmr.msra.gmra.mrb[4].mxu1 %v127_v28  ;;  %1868 = vmatpush3.bf16.msra.mxu0 %v2062_v26  ;;  %v2114_v26 = vld [vmem:[%s2633_s1 + $0x3e8] sm:$0xff]  }
  0x45   :  { %1890 = vmatpush3.bf16.msra.mxu1 %v2063_v29  ;;  %1869 = vmatprep.subr.bf16.mxu0 %v2064_v30  ;;  %v2116_v28 = vld [vmem:[%s2633_s1 + $0x3a8] sm:$0xff]   ;;  %v2117_v29 = vld [vmem:[%s2633_s1 + $0x370] sm:$0xff]  }
  0x46   :  { %1891 = vmatprep.subr.bf16.mxu1 %v2065_v31  ;;  %1359 = vmatprep.mubr.bf16.mxu0 %v130_v63  ;;  %v2118_v30 = vld [vmem:[%s2633_s1 + $0x3f0] sm:$0xff]  }
  0x47   :  { %1399 = vmatprep.mubr.bf16.mxu1 %v132_v2  ;;  %v2119_v31 = vld [vmem:[%s2633_s1 + $0x330] sm:$0xff]  }
  0x48   :  { %1870 = vmatpush3.bf16.msra.mxu0 %v2066_v32  ;;  %v2120_v32 = vld [vmem:[%s2633_s1 + $0x3b0] sm:$0xff]  }
  0x49   :  { %1892 = vmatpush3.bf16.msra.mxu1 %v2067_v33  ;;  %1871 = vmatprep.subr.bf16.mxu0 %v2068_v34  ;;  %v32_v33 = vld [vmem:[%s2632_s0 + $0x18] sm:$0xff] }
  0x4a   :  { %1893 = vmatprep.subr.bf16.mxu1 %v2069_v35  ;;  %v2121_v34 = vld [vmem:[%s2633_s1 + $0x378] sm:$0xff]   ;;  %v95_v35 = vrot.slane %v32_v33, %v2289_v41 }
  0x4c   :  { %1872 = vmatpush3.bf16.msra.mxu0 %v2070_v36  ;;  %v88_v36 = vcombine.high %v32_v33, %v32_v33 }
  0x4d   :  { %1894 = vmatpush3.bf16.msra.mxu1 %v2071_v37  ;;  %1873 = vmatprep.subr.bf16.mxu0 %v2072_v38  ;;  %v2122_v37 = vld [vmem:[%s2633_s1 + $0x3f8] sm:$0xff]   ;;  %v103_v38 = vcombine.high %v95_v35, %v95_v35 }
  0x4e   :  { %1895 = vmatprep.subr.bf16.mxu1 %v2073_v39  ;;  %v102_v39 = vrot.slane %v88_v36, %v2289_v41 }
  0x50   :  { %1874 = vmatpush3.bf16.msra.mxu0 %v2074_v40 }
  0x51   :  { %1896 = vmatpush3.bf16.msra.mxu1 %v2075_v42  ;;  %1875 = vmatprep.subr.bf16.mxu0 %v2076_v43 }
  0x52   :  { %1897 = vmatprep.subr.bf16.mxu1 %v2077_v44 }
  0x54   :  { %1876 = vmatpush3.bf16.msra.mxu0 %v2078_v45 }
  0x55   :  { %1898 = vmatpush3.bf16.msra.mxu1 %v2079_v46  ;;  %1877 = vmatprep.subr.bf16.mxu0 %v2080_v47 }
  0x56   :  { %1899 = vmatprep.subr.bf16.mxu1 %v2081_v48 }
  0x58   :  { %1878 = vmatpush3.bf16.msra.mxu0 %v2082_v49 }
  0x59   :  { %1900 = vmatpush3.bf16.msra.mxu1 %v2083_v50  ;;  %1879 = vmatprep.subr.bf16.mxu0 %v2084_v51 }
  0x5a   :  { %1901 = vmatprep.subr.bf16.mxu1 %v2085_v52 }
  0x5c   :  { %1880 = vmatpush3.bf16.msra.mxu0 %v2086_v54 }
  0x5d   :  { %1902 = vmatpush3.bf16.msra.mxu1 %v2087_v57  ;;  %1881 = vmatprep.subr.bf16.mxu0 %v2088_v58 }
  0x5e   :  { %1903 = vmatprep.subr.bf16.mxu1 %v2089_v61 }
  0x60   :  { %1882 = vmatpush3.bf16.msra.mxu0 %v2090_v62 }
  0x61   :  { %1904 = vmatpush3.bf16.msra.mxu1 %v2091_v1  ;;  %1911 = vmatprep.subr.bf16.mxu0 %v2093_v3 }
  0x62   :  { %1933 = vmatprep.subr.bf16.mxu1 %v2094_v4 }
  0x63   :  { %1360 = vmatmul.mubr.bf16.vlgmr.msra.gmra.mrb[8].mxu0 %v129_v6 }
  0x64   :  { %1400 = vmatmul.mubr.bf16.vlgmr.msra.gmra.mrb[8].mxu1 %v131_v7  ;;  %1912 = vmatpush3.bf16.msra.mxu0 %v2095_v5 }
  0x65   :  { %1934 = vmatpush3.bf16.msra.mxu1 %v2096_v8  ;;  %1913 = vmatprep.subr.bf16.mxu0 %v2097_v9 }
  0x66   :  { %1935 = vmatprep.subr.bf16.mxu1 %v2098_v10 }
  0x68   :  { %1914 = vmatpush3.bf16.msra.mxu0 %v2099_v11 }
  0x69   :  { %1936 = vmatpush3.bf16.msra.mxu1 %v2100_v12  ;;  %1915 = vmatprep.subr.bf16.mxu0 %v2101_v13 }
  0x6a   :  { %1937 = vmatprep.subr.bf16.mxu1 %v2102_v14 }
  0x6c   :  { %1916 = vmatpush3.bf16.msra.mxu0 %v2103_v15 }
  0x6d   :  { %1938 = vmatpush3.bf16.msra.mxu1 %v2104_v16  ;;  %1917 = vmatprep.subr.bf16.mxu0 %v2105_v17 }
  0x6e   :  { %1939 = vmatprep.subr.bf16.mxu1 %v2106_v18 }
  0x70   :  { %1918 = vmatpush3.bf16.msra.mxu0 %v2107_v19 }
  0x71   :  { %1940 = vmatpush3.bf16.msra.mxu1 %v2108_v20  ;;  %1919 = vmatprep.subr.bf16.mxu0 %v2109_v21 }
  0x72   :  { %1941 = vmatprep.subr.bf16.mxu1 %v2110_v22 }
  0x74   :  { %1920 = vmatpush3.bf16.msra.mxu0 %v2111_v23 }
  0x75   :  { %1942 = vmatpush3.bf16.msra.mxu1 %v2112_v24  ;;  %1921 = vmatprep.subr.bf16.mxu0 %v2113_v25 }
  0x76   :  { %1943 = vmatprep.subr.bf16.mxu1 %v2114_v26 }
  0x78   :  { %1922 = vmatpush3.bf16.msra.mxu0 %v2115_v27 }
  0x79   :  { %1944 = vmatpush3.bf16.msra.mxu1 %v2116_v28  ;;  %1923 = vmatprep.subr.bf16.mxu0 %v2117_v29 }
  0x7a   :  { %1945 = vmatprep.subr.bf16.mxu1 %v2118_v30 }
  0x7b   :  { %9 = vsyncpa [#allocation3], 0  ;;  %v134_v40 = vpack.c.bf16 %v103_v38, %v103_v38  ;;  %v104_v42 = vcombine.high %v102_v39, %v102_v39  ;;  %v2123_v43 = vld [vmem:[%s2633_s1 + $0x338] sm:$0xff]   ;;  %v133_v46 = vpack.c.bf16 %v95_v35, %v95_v35  ;;  %v135_v41 = vpack.c.bf16 %v102_v39, %v102_v39  ;;  %v2126_v47 = vld [vmem:[%s2634_s2] sm:$0xff]   ;;  %s2157_s27 = smov 64   ;;  %s2158_s29 = smov [#allocation2]  }
  0x7c   :  { %1924 = vmatpush3.bf16.msra.mxu0 %v2119_v31  ;;  %v2124_v44 = vld [vmem:[%s2633_s1 + $0x3b8] sm:$0xff]   ;;  %v2155_v48 = vmov 0.0   ;;  %v2127_v49 = vld [vmem:[%s2634_s2 + $0x8] sm:$0xff]   ;;  %v2128_v50 = vld [vmem:[%s2634_s2 + $0x10] sm:$0xff]   ;;  %vm2156_vm0 = vmmov 0   ;;  %1572 = vrot.lane.b32.xlu0 %v2126_v47, %s2157_s27  ;;  %vm1518_vm2 = vcmask 523264  }
  0x7d   :  { %1946 = vmatpush3.bf16.msra.mxu1 %v2120_v32  ;;  %1925 = vmatprep.subr.bf16.mxu0 %v2121_v34  ;;  %v136_v45 = vpack.c.bf16 %v104_v42, %v104_v42  ;;  %v2129_v51 = vld [vmem:[%s2634_s2 + $0x18] sm:$0xff]   ;;  %v1643_v52 = vld [vmem:[%s2635_s3] ss:$0 sm:$0xff]  ;;  %s1635_s30 = sshll.u32 %s2158_s29, 4  ;;  %vm1627_vm4 = vcmask 50176   ;;  %s1636_s30 = int_to_ptr.vmem [resolvable:$true] %s1635_s30 }
  0x7e   :  { %1947 = vmatprep.subr.bf16.mxu1 %v2122_v37  ;;  %1439 = vmatprep.mubr.bf16.mxu0 %v134_v40  ;;  %s2130_s5 = scalar_lea.vmem %s1636_s30, 32  ;;  %p2135_p1 = scmp.lt.s32.totalorder %s1636_s30, %s1636_s30 }
  0x7f   :  { %1479 = vmatprep.mubr.bf16.mxu1 %v136_v45  ;;  %1515 = vrot.lane.b32.xlu1 %v1643_v52, %s2157_s27  ;;  %p2131_p0 = scmp.ne.s32.totalorder %s1636_s30, %s2130_s5  ;;  %p2136_p2 = scmp.lt.s32.totalorder %s2130_s5, %s2130_s5 }
  0x80   :  { %1926 = vmatpush3.bf16.msra.mxu0 %v2123_v43  ;;  %1574 = vrot.lane.b32.xlu0 %v2127_v49, %s2157_s27 }
  0x81   :  { %1948 = vmatpush3.bf16.msra.mxu1 %v2124_v44  ;;  %1965 = vmatprep.subr.bf16.mxu0 %v2155_v48  ;;  %p2137_p3 = por %p2136_p2, %p2135_p1 }
  0x82   :  { %1977 = vmatprep.subr.bf16.mxu1 %v2155_v48 }
  0x83   :  { %1440 = vmatmul.mubr.bf16.vlgmr.msra.gmra.mrb[12].mxu0 %v133_v46  ;;  %1576 = vrot.lane.b32.xlu1 %v2128_v50, %s2157_s27  ;;  %p2138_p4 = pnand %p2137_p3, %p2131_p0 }
  0x84   :  { %1480 = vmatmul.mubr.bf16.vlgmr.msra.gmra.mrb[12].mxu1 %v135_v41  ;;  %1966 = vmatpush3.bf16.msra.mxu0 %v2126_v47 }
  0x85   :  { %1967 = vmatprep.subr.bf16.mxu0 %v2155_v48  ;;  %1973 = vmatprep.mubr.msk.bf16.mxu0 %vm2156_vm0, %v2155_v48 }
  0x86   :  { %1985 = vmatprep.mubr.msk.bf16.mxu1 %vm2156_vm0, %v2155_v48  ;;  %1578 = vrot.lane.b32.xlu0 %v2129_v51, %s2157_s27 }
  0x88   :  { %1968 = vmatpush3.bf16.msra.mxu0 %v2127_v49 }
  0x89   :  { %1969 = vmatprep.subr.bf16.mxu0 %v2155_v48 }
  0x8c   :  { %1970 = vmatpush3.bf16.msra.mxu0 %v2128_v50 }
  0x8d   :  { %1971 = vmatprep.subr.bf16.mxu0 %v2155_v48 }
  0x90   :  { %1972 = vmatpush3.bf16.msra.mxu0 %v2129_v51 }
  0xee   :  { %v1573_v36 = vpop.permute.xlu0 %1572 }
  0xef   :  { %1978 = vmatpush3.bf16.msra.mxu1 %v1573_v36 }
  0xf0   :  { %1979 = vmatprep.subr.bf16.mxu1 %v2155_v48 }
  0xf1   :  { %v1516_v37 = vpop.permute.xlu1 %1515 }
  0xf2   :  { %v1575_v40 = vpop.permute.xlu0 %1574 }
  0xf3   :  { %1980 = vmatpush3.bf16.msra.mxu1 %v1575_v40 }
  0xf4   :  { %1981 = vmatprep.subr.bf16.mxu1 %v2155_v48 }
  0xf5   :  { %v1577_v43 = vpop.permute.xlu1 %1576 }
  0xf6   :  { %v1795_v53 = vpop.f32.mrb[0].mxu0 }
  0xf7   :  { %v1817_v54 = vpop.f32.mrb[0].mxu1  ;;  %v1796_v55 = vpop.f32.mrb[1].mxu0  ;;  %1982 = vmatpush3.bf16.msra.mxu1 %v1577_v43 }
  0xf8   :  { %v1818_v56 = vpop.f32.mrb[1].mxu1  ;;  %v1797_v57 = vadd.f32 %v1796_v55, %v1795_v53  ;;  %v1798_v59 = vpop.f32.mrb[2].mxu0  ;;  %1983 = vmatprep.subr.bf16.mxu1 %v2155_v48 }
  0xf9   :  { %v1819_v58 = vadd.f32 %v1818_v56, %v1817_v54  ;;  %v1820_v60 = vpop.f32.mrb[2].mxu1  ;;  %v1799_v61 = vpop.f32.mrb[3].mxu0  ;;  %v1777_v54 = vld [vmem:[%s2635_s3 + $0x1] ss:$0 sm:$0xff] }
  0xfa   :  { %v1821_v62 = vpop.f32.mrb[3].mxu1  ;;  %v1202_v63 = vadd.f32 %v1797_v57, %v1643_v52  ;;  %v1579_v45 = vpop.permute.xlu0 %1578 }
  0xfb   :  { %1984 = vmatpush3.bf16.msra.mxu1 %v1579_v45 }
  0xfc   :  { %v1242_v0 = vadd.f32 %v1819_v58, %v1202_v63 }
 0x116   :  { %v1839_v1 = vpop.f32.mrb[4].mxu0 }
 0x117   :  { %v1861_v2 = vpop.f32.mrb[4].mxu1  ;;  %v1840_v3 = vpop.f32.mrb[5].mxu0 }
 0x118   :  { %v1862_v4 = vpop.f32.mrb[5].mxu1  ;;  %v1841_v5 = vadd.f32 %v1840_v3, %v1839_v1  ;;  %v1842_v7 = vpop.f32.mrb[6].mxu0 }
 0x119   :  { %v1863_v6 = vadd.f32 %v1862_v4, %v1861_v2  ;;  %v1864_v8 = vpop.f32.mrb[6].mxu1  ;;  %v1843_v9 = vpop.f32.mrb[7].mxu0 }
 0x11a   :  { %v1865_v10 = vpop.f32.mrb[7].mxu1  ;;  %v1282_v11 = vadd.f32 %v1841_v5, %v1242_v0 }
 0x11c   :  { %v1322_v12 = vadd.f32 %v1863_v6, %v1282_v11 }
 0x136   :  { %v1883_v13 = vpop.f32.mrb[8].mxu0 }
 0x137   :  { %v1905_v14 = vpop.f32.mrb[8].mxu1  ;;  %v1884_v15 = vpop.f32.mrb[9].mxu0 }
 0x138   :  { %v1906_v16 = vpop.f32.mrb[9].mxu1  ;;  %v1885_v17 = vadd.f32 %v1884_v15, %v1883_v13  ;;  %v1886_v19 = vpop.f32.mrb[10].mxu0 }
 0x139   :  { %v1907_v18 = vadd.f32 %v1906_v16, %v1905_v14  ;;  %v1908_v20 = vpop.f32.mrb[10].mxu1  ;;  %v1887_v21 = vpop.f32.mrb[11].mxu0 }
 0x13a   :  { %v1909_v22 = vpop.f32.mrb[11].mxu1  ;;  %v1362_v23 = vadd.f32 %v1885_v17, %v1322_v12 }
 0x13c   :  { %v1402_v24 = vadd.f32 %v1907_v18, %v1362_v23 }
 0x156   :  { %v1927_v25 = vpop.f32.mrb[12].mxu0 }
 0x157   :  { %v1949_v26 = vpop.f32.mrb[12].mxu1  ;;  %v1928_v27 = vpop.f32.mrb[13].mxu0 }
 0x158   :  { %v1950_v28 = vpop.f32.mrb[13].mxu1  ;;  %v1929_v29 = vadd.f32 %v1928_v27, %v1927_v25  ;;  %v1930_v31 = vpop.f32.mrb[14].mxu0 }
 0x159   :  { %v1951_v30 = vadd.f32 %v1950_v28, %v1949_v26  ;;  %v1952_v32 = vpop.f32.mrb[14].mxu1  ;;  %v1931_v33 = vpop.f32.mrb[15].mxu0 }
 0x15a   :  { %v1953_v34 = vpop.f32.mrb[15].mxu1  ;;  %v1442_v35 = vadd.f32 %v1929_v29, %v1402_v24 }
 0x15c   :  { %v1482_v38 = vadd.f32 %v1951_v30, %v1442_v35 }
 0x15e   :  { %vm1487_vm1 = vcmp.gt.f32.partialorder %v1482_v38, 0.0  ;;  %v1488_v39 = vmul.f32 0.01, %v1482_v38 }
 0x160   :  { %v1489_v42 = vsel %vm1487_vm1, %v1482_v38, %v1488_v39 }
 0x161   :  { %v1490_v44 = vpack.c.bf16 %v1489_v42, %v1489_v42 }
 0x163   :  { %1974 = vmatmul.mubr.msk.bf16.vlgmr.msra.gmra.mrb[16].mxu0 %vm1518_vm2, %v1490_v44 }
 0x236   :  { %v1556_v46 = vpop.f32.mrb[16].mxu0 }
 0x237   :  { %v1557_v41 = vadd.f32 %v1556_v46, %v1516_v37  ;;  %v1975_v47 = vpop.f32.mrb[17].mxu0 }
 0x238   :  { %v1559_v49 = vpop.f32.mrb[18].mxu0 }
 0x239   :  { %vm1562_vm3 = vcmp.gt.f32.partialorder %v1557_v41, 0.0  ;;  %v1563_v50 = vmul.f32 0.01, %v1557_v41  ;;  %v1976_v51 = vpop.f32.mrb[19].mxu0 }
 0x23b   :  { %v1564_v52 = vsel %vm1562_vm3, %v1557_v41, %v1563_v50 }
 0x23c   :  { %v1565_v53 = vpack.c.bf16 %v1564_v52, %v1564_v52 }
 0x23e   :  { %1986 = vmatmul.mubr.msk.bf16.vlgmr.msra.gmra.mrb[16].mxu1 %vm1518_vm2, %v1565_v53 }
 0x311   :  { %v1621_v48 = vpop.f32.mrb[16].mxu1 }
 0x312   :  { %v1622_v55 = vadd.f32 %v1777_v54, %v1621_v48  ;;  %v1987_v56 = vpop.f32.mrb[17].mxu1 }
 0x313   :  { %v1624_v57 = vpop.f32.mrb[18].mxu1 }
 0x314   :  { %v1988_v58 = vpop.f32.mrb[19].mxu1  ;;  %1628 = vst.msk [vmem:[#allocation2] sm:$0x3] %vm1627_vm4, %v1622_v55 }
 0x315   :  { %2141 = shalt.err (!%p2138_p4)
}
 0x316   :  { %s2142_s3 = scalar_lea.hbm %s2636_s4, 32 }
 0x317   :  { %p2143_p5 = scmp.ne.s32.totalorder %s2636_s4, %s2142_s3  ;;  %p2146_p6 = scmp.lt.u32.totalorder %s2142_s3, %s2636_s4 }
 0x319   :  { %p2148_p7 = pnand %p2146_p6, %p2143_p5 }
 0x31b   :  { %2151 = shalt.err (!%p2148_p7)
}
 0x31c   :  { %1638 = dma.vmem_to_hbm [thread:$0]  %s1636_s30, 32, %s2636_s4, [#allocation3]  }
 0x31d   :  { %2152 = dma.done.wait [#allocation3], 32  }
 0x31e   :  { %2153 = vsyncadd [#allocation3], 4294967264 }
 0x31f   :  { %1642 = vsyncpa [#allocation3], 1 }

</bundles_post_ra>
